<compile_context>
chip_gen: v6e
topology: v6e:2x2x1
jax: 0.10.0
libtpu: 0.0.40
codegen_flags: <defaults>
</compile_context>

<pallas_src>
import jax
import jax.numpy as jnp
from jax.experimental import pallas as pl
from jax.experimental.pallas import tpu as pltpu


def linear_out1_kernel(xt_ref, w_ref, b_ref, o_ref):
    # xt_ref: (IN, TB)  -- batch along lanes
    # w_ref : (IN, 1)   -- weight column, VMEM-resident across the grid
    # b_ref : (1, 1)    -- bias scalar in SMEM
    # o_ref : (1, TB)   -- lane-dense output tile
    prod = xt_ref[...] * w_ref[...]                 # VPU, lane-broadcast of w
    red = jnp.sum(prod, axis=0, keepdims=True)      # XLU sublane reduce -> (1, TB)
    o_ref[...] = (red + b_ref[0, 0]).astype(o_ref.dtype)


def wine_model_forward(x, weight, bias, *, tb=512):
    """Equivalent of torch.nn.Linear(in_features, 1).forward(x).

    x:      (B, in_features)  float32
    weight: (1, in_features)  float32  (PyTorch convention, out_features == 1)
    bias:   (1,)              float32
    returns (B, 1) float32
    """
    B, IN = x.shape
    OUT = weight.shape[0]
    assert OUT == 1, "kernel is specialized for the wine model (out_features=1)"
    assert weight.shape[1] == IN

    # Clamp the lane tile for small batches (lane dim must be a multiple of
    # 128), then pad the batch to a tile multiple.
    b_lane = max(128, ((B + 127) // 128) * 128)
    tb = min(tb, b_lane)
    num_tiles = pl.cdiv(B, tb)
    b_pad = num_tiles * tb

    xt = x.T                                           # (IN, B) -- batch on lanes
    if b_pad != B:
        xt = jnp.pad(xt, ((0, 0), (0, b_pad - B)))     # (IN, Bpad)
    w_col = weight.reshape(IN, 1)                      # (IN, 1), no transpose HLO
    b_smem = bias.reshape(1, 1)                        # scalar -> SMEM

    out = pl.pallas_call(
        linear_out1_kernel,
        out_shape=jax.ShapeDtypeStruct((1, b_pad), x.dtype),
        grid=(num_tiles,),
        in_specs=[
            pl.BlockSpec((IN, tb), lambda i: (0, i)),      # x tile: batch on lanes
            pl.BlockSpec((IN, 1), lambda i: (0, 0)),       # weight: resident
            pl.BlockSpec(memory_space=pltpu.SMEM),         # bias: SMEM scalar
        ],
        out_specs=pl.BlockSpec((1, tb), lambda i: (0, i)), # lane-dense stores
        compiler_params=pltpu.CompilerParams(
            dimension_semantics=("parallel",),             # megacore splits rows
        ),
    )(xt, w_col, b_smem)

    return out[0, :B].reshape(B, OUT)


if __name__ == "__main__":
    # Wine quality dataset: 11 physico-chemical features, 1 output (quality).
    IN_FEATURES = 11
    OUT_FEATURES = 1
    BATCH = 33   # small, deliberately not a lane multiple (exercises padding)

    key = jax.random.PRNGKey(0)
    kx, kw, kb = jax.random.split(key, 3)

    x = jax.random.normal(kx, (BATCH, IN_FEATURES), dtype=jnp.float32)
    # Deterministic init mimicking nn.Linear's uniform(-1/sqrt(in), 1/sqrt(in)).
    bound = 1.0 / (IN_FEATURES ** 0.5)
    weight = jax.random.uniform(
        kw, (OUT_FEATURES, IN_FEATURES), minval=-bound, maxval=bound,
        dtype=jnp.float32)
    bias = jax.random.uniform(
        kb, (OUT_FEATURES,), minval=-bound, maxval=bound, dtype=jnp.float32)

    fwd = jax.jit(wine_model_forward)
    out = jax.block_until_ready(fwd(x, weight, bias))

    # Correctness check against plain JAX reference.
    ref = x @ weight.T + bias
    assert out.shape == (BATCH, OUT_FEATURES), out.shape
    assert jnp.allclose(out, ref, atol=1e-5, rtol=1e-5), \
        float(jnp.max(jnp.abs(out - ref)))

    print("KERNEL_OK")
</pallas_src>

<mosaic_0001>
module attributes {stable_mosaic.version = 11 : i64} {
  func.func @linear_out1_kernel(%arg0: i32, %arg1: memref<11x128xf32, #tpu.memory_space<vmem>>, %arg2: memref<11x1xf32, #tpu.memory_space<vmem>>, %arg3: memref<1x1xf32, #tpu.memory_space<smem>>, %arg4: memref<1x128xf32, #tpu.memory_space<vmem>>) attributes {dimension_semantics = [#tpu.dimension_semantics<parallel>], iteration_bounds = array<i64: 1>, scalar_prefetch = 0 : i64, scratch_operands = 0 : i64, tpu.core_type = #tpu.core_type<tc>, window_params = [{transform_indices = @transform_0, window_bounds = array<i64: 11, 128>}, {pipeline_mode = #tpu.pipeline_mode<synchronous>, transform_indices = @transform_1, window_bounds = array<i64: 11, 1>}, {transform_indices = @transform_2, window_bounds = array<i64: 1, 1>}, {transform_indices = @transform_3, window_bounds = array<i64: 1, 128>}]} {
    %c0 = arith.constant 0 : index
    %c0_0 = arith.constant 0 : index
    %0 = vector.load %arg1[%c0, %c0_0] : memref<11x128xf32, #tpu.memory_space<vmem>>, vector<11x128xf32>
    %c0_1 = arith.constant 0 : index
    %c0_2 = arith.constant 0 : index
    %1 = vector.load %arg2[%c0_1, %c0_2] : memref<11x1xf32, #tpu.memory_space<vmem>>, vector<11x1xf32>
    %2 = vector.broadcast %1 : vector<11x1xf32> to vector<11x128xf32>
    %3 = arith.mulf %0, %2 : vector<11x128xf32>
    %cst = arith.constant dense<0.000000e+00> : vector<128xf32>
    %4 = vector.multi_reduction <add>, %3, %cst [0] : vector<11x128xf32> to vector<128xf32>
    %5 = vector.shape_cast %4 : vector<128xf32> to vector<1x128xf32>
    %c0_3 = arith.constant 0 : index
    %c0_4 = arith.constant 0 : index
    %6 = memref.load %arg3[%c0_3, %c0_4] : memref<1x1xf32, #tpu.memory_space<smem>>
    %7 = vector.broadcast %6 : f32 to vector<1x128xf32>
    %8 = arith.addf %5, %7 : vector<1x128xf32>
    %c0_5 = arith.constant 0 : index
    %c0_6 = arith.constant 0 : index
    %9 = vector.load %arg4[%c0_5, %c0_6] : memref<1x128xf32, #tpu.memory_space<vmem>>, vector<1x128xf32>
    tpu.vector_store %arg4[%c0_5, %c0_6], %8 {strides = array<i32>} : memref<1x128xf32, #tpu.memory_space<vmem>>, vector<1x128xf32>,
    return
  }
  func.func @transform_0(%arg0: i32) -> (i32, i32) {
    %c0_i32 = arith.constant 0 : i32
    %c0_i32_0 = arith.constant 0 : i32
    return %c0_i32, %arg0 : i32, i32
  }
  func.func @transform_1(%arg0: i32) -> (i32, i32) {
    %c0_i32 = arith.constant 0 : i32
    %c0_i32_0 = arith.constant 0 : i32
    %c0_i32_1 = arith.constant 0 : i32
    return %c0_i32, %c0_i32_0 : i32, i32
  }
  func.func @transform_2(%arg0: i32) -> (i32, i32) {
    %c0_i32 = arith.constant 0 : i32
    %c0_i32_0 = arith.constant 0 : i32
    %c0_i32_1 = arith.constant 0 : i32
    return %c0_i32, %c0_i32_0 : i32, i32
  }
  func.func @transform_3(%arg0: i32) -> (i32, i32) {
    %c0_i32 = arith.constant 0 : i32
    %c0_i32_0 = arith.constant 0 : i32
    return %c0_i32, %arg0 : i32, i32
  }
}

</mosaic_0001>

<bundles_post_ra>
// kernel: wine_model_forward.1
= control target key start
LH: loop header
LB: loop body
LE: loop exit
PB: predicated region body
PF: predicated region fallthrough
CT: control target
= control target key end

     0   :  { %v50_v0 = vmov 0   ;;  %vm31_vm0 = vcmask 1042432   ;;  %s89_s1 = inlined_call_operand.vmem [shape: f32[11,1], index: 1, kind: input, shape index: {}]   ;;  %s90_s0 = inlined_call_operand.vmem [shape: f32[11,128], index: 0, kind: input, shape index: {}]   ;;  %s91_s2 = inlined_call_operand.<no memory space> [shape: f32[1,1], index: 2, kind: input, shape index: {}]   ;;  %s92_s3 = inlined_call_operand.vmem [shape: f32[1,128], index: 3, kind: output, shape index: {}]  }
   0x1   :  { %49 = vset.pattern.permute.xlu0 %v50_v0  ;;  %v18_v1 = vld [vmem:[%s89_s1 + $0x8] sm:$0x7]  ;;  %v17_v2 = vld [vmem:[%s89_s1] sm:$0xff]  ;;  %v41_v16 = vstv %s91_s2 }
   0x2   :  { %26 = vperm.xlu0 %49, %v18_v1   ;;  %v16_v3 = vld [vmem:[%s90_s0 + $0x8] sm:$0x7]  ;;  %v15_v6 = vld [vmem:[%s90_s0] sm:$0xff] }
   0x6   :  { %21 = vperm.xlu0 %49, %v17_v2  }
  0x7d   :  { %v27_v4 = vpop.permute.xlu0 %26 }
  0x7e   :  { %v30_v5 = vmul.f32 %v27_v4, %v16_v3 }
  0x80   :  { %v32_v9 = vsel %vm31_vm0, %v30_v5, 0.0 }
  0x81   :  { %v22_v7 = vpop.permute.xlu0 %21 }
  0x82   :  { %v29_v8 = vmul.f32 %v22_v7, %v15_v6 }
  0x84   :  { %v33_v10 = vadd.f32 %v32_v9, %v29_v8 }
  0x86   :  { %v34_v11 = vrot.slane %v33_v10, 4 }
  0x88   :  { %v35_v12 = vadd.f32 %v34_v11, %v33_v10 }
  0x8a   :  { %v36_v13 = vrot.slane %v35_v12, 2 }
  0x8c   :  { %v37_v14 = vadd.f32 %v36_v13, %v35_v12 }
  0x8e   :  { %v38_v15 = vrot.slane %v37_v14, 1 }
  0x90   :  { %v39_v17 = vadd.f32 %v38_v15, %v37_v14 }
  0x92   :  { %v42_v18 = vadd.f32 %v41_v16, %v39_v17 }
  0x94   :  { %43 = vst [vmem:[%s92_s3] sm:$0x1] %v42_v18 }

</bundles_post_ra>
